<compile_context>
chip_gen: v7x
topology: tpu7x:2x2x1
jax: 0.10.0
libtpu: 0.0.40
codegen_flags: <defaults>
</compile_context>

<pallas_src>
import math

import jax
import jax.numpy as jnp
from jax.experimental import pallas as pl
from jax.experimental.pallas import tpu as pltpu

_LANE = 128


def _ceil_to(x: int, m: int) -> int:
    return ((x + m - 1) // m) * m


def _pick_batch_tile(B, S, *, target_rows=256, min_steps=2, max_rows=4096,
                     score_budget_bytes=12 << 20):
    """Pick Bt = batch elements per grid step.

    - Bt divides B (exact blocking, no ragged edge).
    - Keep >= min_steps grid steps when possible (v7x has 2 TensorCores that
      shard the 'parallel' axis; a 1-step grid leaves one TC idle).
    - Within that, prefer M = Bt*S >= target_rows so the projection matmul
      fills the MXU (128 rows v5e / 256 rows v6e-v7x) and per-step pipeline
      overhead is amortized.
    - Cap Bt by a rough VMEM budget for the ~3 live (Bt, S, S) f32 score
      temporaries (s, e, atten).
    """
    divs = [d for d in range(1, B + 1)
            if B % d == 0
            and d * S <= max_rows
            and 3 * 4 * d * S * S <= score_budget_bytes]
    if not divs:
        divs = [1]
    pref = [d for d in divs if B // d >= min_steps]
    pool = pref if pref else divs
    hit = [d for d in pool if d * S >= target_rows]
    # Smallest tile that already meets the row target (keeps more parallel
    # steps / less VMEM); otherwise the fattest tile available.
    return min(hit) if hit else max(pool)


def _make_attn_kernel(norm_fact: float, dim_v: int, lk: int, lv: int,
                      bt: int, seq: int):
    def attn_kernel(x_ref, wqkv_ref, bqkv_ref, o_ref):
        # x_ref: (1, Bt*S, Din) bf16 — already flattened in the wrapper, so no
        # in-kernel batch/seq merge (not a view; would cost a VMEM relayout).
        x2d = x_ref[0]                                               # (Bt*S, Din)

        # Fused lane-aligned Q|K|V projection: ONE MXU matmul, bf16 operands,
        # f32 accumulation.  Each of Q/K/V owns a zero-padded 128-lane group.
        qkv = (
            jnp.dot(x2d, wqkv_ref[...], preferred_element_type=jnp.float32)
            + bqkv_ref[...]
        )                                                            # (Bt*S, Dtot) f32
        qkv = qkv.reshape(bt, seq, 2 * lk + lv)                      # split leading dims only

        # Full aligned lane-group slices -> zero-cost views (no masked selects).
        q = qkv[:, :, :lk]                                           # (Bt, S, Lk)  zero-padded feats
        k = qkv[:, :, lk:2 * lk]                                     # (Bt, S, Lk)
        v = qkv[:, :, 2 * lk:]                                       # (Bt, S, Lv)  zero-padded feats

        # scores = Q @ K^T (batched over Bt); the zero-padded feature columns
        # contribute nothing, and K<128 rounds up to a full MXU pass anyway.
        s = jax.lax.dot_general(
            q, k, dimension_numbers=(((2,), (2,)), ((0,), (0,))),
            preferred_element_type=jnp.float32)                      # (Bt, S, S) f32

        # Numerically stable softmax in f32; the module's post-softmax
        # 1/sqrt(Dk) scale is folded into the EUP reciprocal multiply.
        m = jnp.max(s, axis=-1, keepdims=True)
        e = jnp.exp(s - m)
        denom = jnp.sum(e, axis=-1, keepdims=True)
        atten = e * (pl.reciprocal(denom, approx=True) * norm_fact)  # (Bt, S, S)

        # output = atten @ V (batched), bf16 operands / f32 accumulation.
        out = jax.lax.dot_general(
            atten.astype(jnp.bfloat16), v.astype(jnp.bfloat16),
            dimension_numbers=(((2,), (1,)), ((0,), (0,))),
            preferred_element_type=jnp.float32)                      # (Bt, S, Lv)

        # Lane-dense store: last dim is a full 128-lane group -> unmasked vst.
        # Columns >= Dv are exactly zero and sliced away in the wrapper.
        o_ref[...] = out.astype(o_ref.dtype)

    return attn_kernel


def self_attention_pallas(x, wq, bq, wk, bk, wv, bv, *,
                          target_rows=256, min_grid_steps=2):
    """x: (B, S, Din); wq/wk: (Din, Dk); wv: (Din, Dv); biases (1, Dk)/(1, Dv)."""
    B, S, Din = x.shape
    Dk = wq.shape[1]
    Dv = wv.shape[1]
    norm_fact = 1.0 / math.sqrt(Dk)

    Bt = _pick_batch_tile(B, S, target_rows=target_rows, min_steps=min_grid_steps)
    G = B // Bt

    # Lane-aligned fused projection weight [Wq|0 | Wk|0 | Wv|0]: each group is
    # rounded up to a multiple of 128 lanes.  Padded bias columns are zero so
    # the padded features are exactly 0 and drop out of Q@K^T and atten@V.
    Lk = _ceil_to(Dk, _LANE)
    Lv = _ceil_to(Dv, _LANE)
    Dtot = 2 * Lk + Lv
    wqkv = jnp.zeros((Din, Dtot), jnp.float32)
    wqkv = wqkv.at[:, :Dk].set(wq)
    wqkv = wqkv.at[:, Lk:Lk + Dk].set(wk)
    wqkv = wqkv.at[:, 2 * Lk:2 * Lk + Dv].set(wv)
    bqkv = jnp.zeros((1, Dtot), jnp.float32)
    bqkv = bqkv.at[:, :Dk].set(bq.reshape(1, Dk))
    bqkv = bqkv.at[:, Lk:Lk + Dk].set(bk.reshape(1, Dk))
    bqkv = bqkv.at[:, 2 * Lk:2 * Lk + Dv].set(bv.reshape(1, Dv))

    # bf16 MXU operands (f32 accumulation happens in-kernel); halves DMA bytes.
    x_in = x.astype(jnp.bfloat16).reshape(G, Bt * S, Din)   # wrapper-side flatten
    wqkv = wqkv.astype(jnp.bfloat16)

    kernel = _make_attn_kernel(norm_fact, Dv, Lk, Lv, Bt, S)

    # Advisory cost estimate for XLA's scheduler (logical flops, not padded).
    flops = 2 * B * S * (Din * (2 * Dk + Dv) + S * Dk + S * Dv)
    transcendentals = B * S * S
    bytes_accessed = (x_in.size * 2 + wqkv.size * 2 + bqkv.size * 4
                      + B * S * Lv * 4)

    out_pad = pl.pallas_call(
        kernel,
        out_shape=jax.ShapeDtypeStruct((B, S, Lv), x.dtype),
        grid_spec=pltpu.PrefetchScalarGridSpec(
            num_scalar_prefetch=0,
            grid=(G,),
            in_specs=[
                pl.BlockSpec((1, Bt * S, Din), lambda b: (b, 0, 0)),  # x tile
                pl.BlockSpec((Din, Dtot), lambda b: (0, 0)),          # fused W (grid-invariant)
                pl.BlockSpec((1, Dtot), lambda b: (0, 0)),            # fused b (grid-invariant)
            ],
            out_specs=pl.BlockSpec((Bt, S, Lv), lambda b: (b, 0, 0)),
        ),
        compiler_params=pltpu.CompilerParams(
            dimension_semantics=("parallel",),          # megacore / v7x dual-TC sharding
            vmem_limit_bytes=32 * 1024 * 1024,          # raise with Bt/S if tiles grow
        ),
        cost_estimate=pl.CostEstimate(
            flops=flops,
            transcendentals=transcendentals,
            bytes_accessed=bytes_accessed,
        ),
    )(x_in, wqkv, bqkv)

    # Drop the zero lane padding of the V group.
    return out_pad[:, :, :Dv]


def self_attention_ref(x, wq, bq, wk, bk, wv, bv):
    """Pure-JAX reference mirroring the PyTorch forward exactly (f32)."""
    q = x @ wq + bq
    k = x @ wk + bk
    v = x @ wv + bv
    dk = wq.shape[1]
    s = jnp.einsum("bsd,btd->bst", q, k)
    atten = jax.nn.softmax(s, axis=-1) * (1.0 / math.sqrt(dk))
    return jnp.einsum("bst,btd->bsd", atten, v)


if __name__ == "__main__":
    # Small shapes consistent with the module: batch=2, seq=8, input_dim=32,
    # dim_k=16, dim_v=16.
    B, S, Din, Dk, Dv = 2, 8, 32, 16, 16

    key = jax.random.PRNGKey(0)
    kx, kq, kbq, kk, kbk, kv, kbv = jax.random.split(key, 7)

    x = jax.random.normal(kx, (B, S, Din), dtype=jnp.float32)

    # Deterministic parameter init (nn.Linear-style uniform bound).
    bound = 1.0 / math.sqrt(Din)
    wq = jax.random.uniform(kq, (Din, Dk), jnp.float32, -bound, bound)
    bq = jax.random.uniform(kbq, (1, Dk), jnp.float32, -bound, bound)
    wk = jax.random.uniform(kk, (Din, Dk), jnp.float32, -bound, bound)
    bk = jax.random.uniform(kbk, (1, Dk), jnp.float32, -bound, bound)
    wv = jax.random.uniform(kv, (Din, Dv), jnp.float32, -bound, bound)
    bv = jax.random.uniform(kbv, (1, Dv), jnp.float32, -bound, bound)

    out = self_attention_pallas(x, wq, bq, wk, bk, wv, bv)
    out = jax.block_until_ready(out)

    ref = self_attention_ref(x, wq, bq, wk, bk, wv, bv)
    assert out.shape == (B, S, Dv)
    # Tolerance covers bf16 MXU operands (f32 accumulation) and the EUP
    # approximate reciprocal used for the softmax denominator.
    assert jnp.allclose(out, ref, atol=1e-2, rtol=1e-2), "mismatch vs reference"

    print("KERNEL_OK")
</pallas_src>

<mosaic_0001>
module attributes {stable_mosaic.version = 11 : i64} {
  func.func @attn_kernel(%arg0: i32, %arg1: memref<1x8x32xbf16, #tpu.memory_space<vmem>>, %arg2: memref<32x384xbf16, #tpu.memory_space<vmem>>, %arg3: memref<1x384xf32, #tpu.memory_space<vmem>>, %arg4: memref<1x8x128xf32, #tpu.memory_space<vmem>>) attributes {dimension_semantics = [#tpu.dimension_semantics<parallel>], iteration_bounds = array<i64: 2>, scalar_prefetch = 0 : i64, scratch_operands = 0 : i64, tpu.core_type = #tpu.core_type<tc>, window_params = [{transform_indices = @transform_0, window_bounds = array<i64: 1, 8, 32>}, {pipeline_mode = #tpu.pipeline_mode<synchronous>, transform_indices = @transform_1, window_bounds = array<i64: 32, 384>}, {pipeline_mode = #tpu.pipeline_mode<synchronous>, transform_indices = @transform_2, window_bounds = array<i64: 1, 384>}, {transform_indices = @transform_3, window_bounds = array<i64: 1, 8, 128>}]} {
    %c0 = arith.constant 0 : index
    %c0_0 = arith.constant 0 : index
    %c0_1 = arith.constant 0 : index
    %0 = vector.load %arg1[%c0, %c0_0, %c0_1] : memref<1x8x32xbf16, #tpu.memory_space<vmem>>, vector<1x8x32xbf16>
    %1 = vector.shape_cast %0 : vector<1x8x32xbf16> to vector<8x32xbf16>
    %c0_2 = arith.constant 0 : index
    %c0_3 = arith.constant 0 : index
    %2 = vector.load %arg2[%c0_2, %c0_3] : memref<32x384xbf16, #tpu.memory_space<vmem>>, vector<32x384xbf16>
    %cst = arith.constant dense<0.000000e+00> : vector<8x384xf32>
    %3 = tpu.matmul %1, %2, %cst {dimension_numbers = #tpu.dot_dimension_numbers<[1], [0], [0], [1], [0, 0, 1, 1], [], []>} : vector<8x32xbf16>, vector<32x384xbf16>, vector<8x384xf32> -> vector<8x384xf32>
    %c0_4 = arith.constant 0 : index
    %c0_5 = arith.constant 0 : index
    %4 = vector.load %arg3[%c0_4, %c0_5] : memref<1x384xf32, #tpu.memory_space<vmem>>, vector<1x384xf32>
    %5 = vector.broadcast %4 : vector<1x384xf32> to vector<8x384xf32>
    %6 = arith.addf %3, %5 : vector<8x384xf32>
    %7 = vector.shape_cast %6 : vector<8x384xf32> to vector<1x8x384xf32>
    %8 = vector.extract_strided_slice %7 {offsets = [0, 0, 0], sizes = [1, 8, 128], strides = [1, 1, 1]} : vector<1x8x384xf32> to vector<1x8x128xf32>
    %9 = vector.extract_strided_slice %7 {offsets = [0, 0, 128], sizes = [1, 8, 128], strides = [1, 1, 1]} : vector<1x8x384xf32> to vector<1x8x128xf32>
    %10 = vector.extract_strided_slice %7 {offsets = [0, 0, 256], sizes = [1, 8, 128], strides = [1, 1, 1]} : vector<1x8x384xf32> to vector<1x8x128xf32>
    %cst_6 = arith.constant dense<0.000000e+00> : vector<1x8x8xf32>
    %11 = tpu.matmul %8, %9, %cst_6 {dimension_numbers = #tpu.dot_dimension_numbers<[2], [2], [1], [1], [0, 0, 0, 1, 1, 1], [0], [0]>} : vector<1x8x128xf32>, vector<1x8x128xf32>, vector<1x8x8xf32> -> vector<1x8x8xf32>
    %cst_7 = arith.constant dense<0xFF800000> : vector<1x8xf32>
    %12 = vector.multi_reduction <maximumf>, %11, %cst_7 [2] : vector<1x8x8xf32> to vector<1x8xf32>
    %13 = vector.shape_cast %12 : vector<1x8xf32> to vector<1x8x1xf32>
    %14 = vector.broadcast %13 : vector<1x8x1xf32> to vector<1x8x8xf32>
    %15 = arith.subf %11, %14 : vector<1x8x8xf32>
    %16 = math.exp %15 : vector<1x8x8xf32>
    %cst_8 = arith.constant dense<0.000000e+00> : vector<1x8xf32>
    %17 = vector.multi_reduction <add>, %16, %cst_8 [2] : vector<1x8x8xf32> to vector<1x8xf32>
    %18 = vector.shape_cast %17 : vector<1x8xf32> to vector<1x8x1xf32>
    %19 = tpu.reciprocal %18 {approx = true} : vector<1x8x1xf32> -> vector<1x8x1xf32>
    %cst_9 = arith.constant 2.500000e-01 : f32
    %20 = vector.broadcast %cst_9 : f32 to vector<1x8x1xf32>
    %21 = arith.mulf %19, %20 : vector<1x8x1xf32>
    %22 = vector.broadcast %21 : vector<1x8x1xf32> to vector<1x8x8xf32>
    %23 = arith.mulf %16, %22 : vector<1x8x8xf32>
    %24 = arith.truncf %23 : vector<1x8x8xf32> to vector<1x8x8xbf16>
    %25 = arith.truncf %10 : vector<1x8x128xf32> to vector<1x8x128xbf16>
    %cst_10 = arith.constant dense<0.000000e+00> : vector<1x8x128xf32>
    %26 = tpu.matmul %24, %25, %cst_10 {dimension_numbers = #tpu.dot_dimension_numbers<[2], [1], [1], [2], [0, 0, 0, 1, 1, 2], [0], [0]>} : vector<1x8x8xbf16>, vector<1x8x128xbf16>, vector<1x8x128xf32> -> vector<1x8x128xf32>
    %c0_11 = arith.constant 0 : index
    %c0_12 = arith.constant 0 : index
    %c0_13 = arith.constant 0 : index
    %27 = vector.load %arg4[%c0_11, %c0_12, %c0_13] : memref<1x8x128xf32, #tpu.memory_space<vmem>>, vector<1x8x128xf32>
    tpu.vector_store %arg4[%c0_11, %c0_12, %c0_13], %26 {strides = array<i32>} : memref<1x8x128xf32, #tpu.memory_space<vmem>>, vector<1x8x128xf32>,
    return
  }
  func.func @transform_0(%arg0: i32) -> (i32, i32, i32) {
    %c0_i32 = arith.constant 0 : i32
    %c0_i32_0 = arith.constant 0 : i32
    %c0_i32_1 = arith.constant 0 : i32
    return %arg0, %c0_i32, %c0_i32_0 : i32, i32, i32
  }
  func.func @transform_1(%arg0: i32) -> (i32, i32) {
    %c0_i32 = arith.constant 0 : i32
    %c0_i32_0 = arith.constant 0 : i32
    %c0_i32_1 = arith.constant 0 : i32
    return %c0_i32, %c0_i32_0 : i32, i32
  }
  func.func @transform_2(%arg0: i32) -> (i32, i32) {
    %c0_i32 = arith.constant 0 : i32
    %c0_i32_0 = arith.constant 0 : i32
    %c0_i32_1 = arith.constant 0 : i32
    return %c0_i32, %c0_i32_0 : i32, i32
  }
  func.func @transform_3(%arg0: i32) -> (i32, i32, i32) {
    %c0_i32 = arith.constant 0 : i32
    %c0_i32_0 = arith.constant 0 : i32
    %c0_i32_1 = arith.constant 0 : i32
    return %arg0, %c0_i32, %c0_i32_0 : i32, i32, i32
  }
}

</mosaic_0001>

<bundles_post_ra>
// kernel: tpu_custom_call.1
= control target key start
LH: loop header
LB: loop body
LE: loop exit
PB: predicated region body
PF: predicated region fallthrough
CT: control target
= control target key end

     0   :  { %8 = vsyncpa [#allocation3], 0  ;;  %s1061_s0 = inlined_call_operand.hbm [shape: bf16[2,8,32], index: 0, kind: input, shape index: {}]   ;;  %s1062_s1 = inlined_call_operand.hbm [shape: bf16[32,384], index: 1, kind: input, shape index: {}]   ;;  %s1063_s2 = inlined_call_operand.vmem [shape: f32[1,384], index: 2, kind: input, shape index: {}]   ;;  %s1064_s3 = inlined_call_operand.hbm [shape: f32[2,8,128], index: 3, kind: output, shape index: {}]  }
   0x1   :  { %10 = vsyncpa [#allocation3 + $0x1], 0 }
   0x2   :  { %11 = vsyncpa [#allocation6], 0 }
   0x3   :  { %12 = vsyncpa [#allocation4], 0 }
   0x4   :  { %14 = vsyncpa [#allocation4 + $0x1], 0  ;;  %s853_s12 = smov 0   ;;  %s855_s13 = smov 0  }
   0x5   :  { %s857_s14 = smov 0   ;;  %s859_s15 = smov 0  }
   0x6 LB: > { %s874_s16 = sadd.s32 4294967295, %s823_s15   ;;  %s572_s17 = sadd.s32 4294967294, %s823_s15   ;;  %s823_s15 = sphi %s859_s15, %s1084_s15   ;;  %s819_s14 = sphi %s857_s14, %s1083_s14   ;;  %s815_s13 = sphi %s855_s13, %s1082_s13   ;;  %s811_s12 = sphi %s853_s12, %s1081_s12  }
   0x7   : > { %p40_p0 = scmp.ne.s32.totalorder %s815_s13, %s811_s12  ;;  %p1065_p1 = scmp.eq.s32.totalorder %s874_s16, 0 }
   0x8   : > { %p112_p3 = scmp.eq.s32.totalorder %s572_s17, 1  ;;  %p573_p5 = scmp.ge.s32.totalorder %s823_s15, 1 }
   0x9   : > { %p883_p4 = por %p1065_p1, %p40_p0  ;;  %p119_p7 = scmp.lt.s32.totalorder %s823_s15, 3 }
   0xa   : > { %p888_p6 = por %p112_p3, %p40_p0  ;;  %s825_s21 = smov [#allocation5]  }
   0xb   : > { %s1068_s18 = scalar_select %p883_p4, 1, 0 }
   0xc   : > { %s1069_s19 = scalar_select %p888_p6, 1, 0 }
   0xd   : > { %p893_p8 = pnand %p573_p5, %p119_p7  ;;  %s131_s22 = sshll.u32 %s825_s21, 4  ;;  %s897_s22 = int_to_ptr.vmem [resolvable:$true] %s131_s22 }
   0xe   : > { %s909_s24 = sadd.s32 1, %s823_s15   ;;  %s27_s25 = sadd.s32 1, %s819_s14 }
   0xf   : > { %s1070_s20 = scalar_select %p893_p8, 1, 0 }
  0x10   : > { %p629_p9 = pneg %p893_p8  ;;  %s24_s26 = ssub.s32 %s823_s15, %s909_s24 }
  0x11   : > { %s695_s29 = scalar_lea.hbm %s1062_s1, 768 }
  0x12   : > { %p904_p11 = pnand %p629_p9, %p1065_p1  ;;  %p696_p12 = scmp.ne.s32.totalorder %s1062_s1, %s695_s29 }
  0x13   : > { %p702_p5 = scmp.lt.u32.totalorder %s695_s29, %s1062_s1 }
  0x14   : > { %p697_p13 = pneg %p904_p11 }
  0x16   : > { %p698_p0 = pnand %p697_p13, %p696_p12 }
  0x18   : > { %p699_p3 = pneg %p698_p0 }
  0x1a   : > { %p704_p7 = pnand %p702_p5, %p699_p3 }
  0x1c   : > { %707 = shalt.err (!%p704_p7)
}
  0x1d   : > { %s708_s7 = scalar_lea.vmem %s897_s22, 768  ;;  %p716_p2 = scmp.lt.s32.totalorder %s897_s22, %s897_s22 }
  0x1e   : > { %p709_p9 = scmp.ne.s32.totalorder %s897_s22, %s708_s7  ;;  %p717_p6 = scmp.lt.s32.totalorder %s708_s7, %s708_s7 }
  0x20   : > { %p711_p10 = pnand %p709_p9, %p697_p13  ;;  %p718_p4 = por %p717_p6, %p716_p2 }
  0x22   : > { %p712_p1 = pneg %p711_p10 }
  0x24   : > { %p719_p8 = pnand %p718_p4, %p712_p1 }
  0x26   : > { %722 = shalt.err (!%p719_p8)
}
  0x27   : > { %s826_s8 = smov 192   ;;  %s827_s9 = smov 12  }
  0x28   : > { %632 = dma.hbm_to_vmem [thread:$0]  (!%p904_p11), %s1062_s1, 768, %s897_s22, [#allocation6], %s826_s8, %s826_s8, %s827_s9  }
  0x29   : > { %p25_p2 = scmp.eq.s32.totalorder %s24_s26, 0  ;;  %p34_p1 = scmp.ne.s32.totalorder %s819_s14, %s815_s13 }
  0x2a   : > { %p35_p4 = scmp.eq.s32.totalorder %s823_s15, 0  ;;  %p642_p6 = scmp.lt.s32.totalorder %s823_s15, 2 }
  0x2b   : > { %s940_s17 = scalar_select %p25_p2, %s819_s14, %s27_s25  }
  0x2c   : > { %p36_p8 = por %p35_p4, %p34_p1  ;;  %p1072_p10 = scmp.eq.s32.totalorder %s874_s16, 1 }
  0x2d   : > { %s148_s27 = sand.u32 1, %s819_s14   ;;  %s577_s28 = sshll.u32 %s823_s15, 6 }
  0x2e   : > { %p944_p12 = por %p1072_p10, %p34_p1  ;;  %s576_s29 = sshll.u32 %s148_s27, 2 }
  0x2f   : > { %s953_s4 = scalar_lea.hbm %s1061_s0, %s577_s28  ;;  %s152_s22 = scalar_lea.vmem [#allocation2], %s576_s29 }
  0x30   : > { %s159_s25 = sshll.u32 %s152_s22, 4  ;;  %p955_p11 = pnand %p642_p6, %p36_p8  ;;  %s959_s25 = int_to_ptr.vmem [resolvable:$true] %s159_s25 }
  0x31   : > { %s149_s5 = scalar_lea.sflag [#allocation3], %s148_s27  ;;  %s723_s6 = scalar_lea.hbm %s953_s4, 64 }
  0x32   : > { %p724_p13 = scmp.ne.s32.totalorder %s953_s4, %s723_s6  ;;  %p725_p0 = pneg %p955_p11 }
  0x33   : > { %s728_s9 = scalar_lea.hbm %s1061_s0, 128  ;;  %p729_p7 = scmp.lt.u32.totalorder %s953_s4, %s1061_s0 }
  0x34   : > { %p726_p3 = pnand %p725_p0, %p724_p13  ;;  %p730_p9 = scmp.lt.u32.totalorder %s728_s9, %s723_s6 }
  0x35   : > { %p732_p1 = scmp.lt.u32.totalorder %s723_s6, %s953_s4 }
  0x36   : > { %p727_p5 = pneg %p726_p3  ;;  %p731_p2 = por %p730_p9, %p729_p7 }
  0x38   : > { %p733_p4 = por %p732_p1, %p731_p2 }
  0x3a   : > { %p734_p6 = pnand %p733_p4, %p727_p5 }
  0x3c   : > { %737 = shalt.err (!%p734_p6)
}
  0x3d   : > { %s738_s27 = scalar_lea.vmem %s959_s25, 64  ;;  %s828_s28 = smov [#allocation2]  }
  0x3e   : > { %p739_p8 = scmp.ne.s32.totalorder %s959_s25, %s738_s27  ;;  %s743_s29 = sshll.u32 %s828_s28, 4  ;;  %s744_s29 = int_to_ptr.vmem [resolvable:$false] %s743_s29 }
  0x3f   : > { %s745_s23 = scalar_lea.vmem %s744_s29, 128  ;;  %p746_p3 = scmp.lt.s32.totalorder %s959_s25, %s744_s29 }
  0x40   : > { %p741_p10 = pnand %p739_p8, %p725_p0  ;;  %p747_p7 = scmp.lt.s32.totalorder %s745_s23, %s738_s27 }
  0x42   : > { %p742_p13 = pneg %p741_p10  ;;  %p748_p9 = por %p747_p7, %p746_p3 }
  0x44   : > { %p749_p2 = pnand %p748_p9, %p742_p13 }
  0x46   : > { %752 = shalt.err (!%p749_p2)
}
  0x47   : > { %636 = dma.hbm_to_vmem [thread:$0]  (!%p955_p11), %s953_s4, 64, %s959_s25, %s149_s5  }
  0x48   : > { %p1075_p5 = scmp.ne.s32.totalorder %s1070_s20, 0 }
  0x49   : > { %s989_s30 = sand.u32 (!%p1075_p5), 1, %s815_s13   ;;  %p1076_p0 = scmp.ne.s32.totalorder (!%p1075_p5), %s1068_s18, 0 }
  0x4a   : > { %168 = sbr.rel (%p1075_p5) target bundleno = 1069 (0x42d), region = 32  ;;  %s579_s22 = sshll.u32 (!%p1075_p5), %s989_s30, 2 }
  0x4b   : > { %s171_s6 = scalar_lea.sflag (!%p1075_p5), [#allocation3], %s989_s30  ;;  %s174_s7 = scalar_lea.vmem (!%p1075_p5), [#allocation2], %s579_s22 }
  0x51   : > { %798 = dma.done.wait (%p1076_p0), %s171_s6, 64  }
  0x52   : > { %800 = vsyncadd (%p1076_p0), %s171_s6, 4294967232  ;;  %p1077_p1 = scmp.eq.s32.totalorder %s874_s16, 0 }
  0x54   : > { %802 = dma.done.wait (%p1077_p1), [#allocation6], 768   ;;  %p1078_p11 = pmov %p1077_p1 }
  0x55   : > { %v829_v0 = vmov 0   ;;  %v683_v1 = vld [vmem:[#allocation5 + $0x4] ss:$12 sps:$4 sm:$0xff]   ;;  %v685_v2 = vld [vmem:[#allocation5] ss:$12 sps:$4 sm:$0xff]   ;;  %vm260_vm0 = vcmask 261120   ;;  %v213_v7 = vlaneseq }
  0x56   : > { %804 = vsyncadd (%p1078_p11), [#allocation6], 4294966528  ;;  %296 = vmatprep.mubr.bf16.mxu0 %v829_v0  ;;  %264 = vmatprep.subr.bf16.mxu0 %v683_v1  ;;  %v686_v3 = vld [vmem:[#allocation5 + $0x1c] ss:$12 sps:$4 sm:$0xff]   ;;  %v688_v4 = vld [vmem:[#allocation5 + $0x18] ss:$12 sps:$4 sm:$0xff]  }
  0x57   : > { %265 = vmatpush1.bf16.msra.mxu0 %v685_v2  ;;  %v202_v5 = vld [vmem:[%s174_s7] sm:$0xf]  ;;  %v830_v6 = vmov 0.0   ;;  %vm831_vm1 = vmmov 0   ;;  %v214_v8 = vshrl.u32 %v213_v7, 7  ;;  %vm415_vm2 = vcmask 64512  }
  0x58   : > { %266 = vmatprep.subr.bf16.mxu0 %v686_v3  ;;  %602 = vmatprep.subr.bf16.mxu1 %v830_v6  ;;  %v211_v10 = vld [vmem:[%s1063_s2] sm:$0x7]  ;;  %v689_v20 = vld [vmem:[#allocation5 + $0x8] ss:$12 sps:$4 sm:$0xff]   ;;  %v690_v21 = vld [vmem:[#allocation5 + $0x20] ss:$12 sps:$4 sm:$0xff]  }
  0x59   : > { %606 = vmatprep.mubr.msk.bf16.mxu1 %vm831_vm1, %v830_v6  ;;  %v219_v9 = vsub.s32 1, %v214_v8  ;;  %v215_v11 = vsub.s32 0, %v214_v8  ;;  %603 = vmatpush3.bf16.msra.mxu1 %v689_v20  ;;  %v223_v30 = vsub.s32 2, %v214_v8  ;;  %vm433_vm3 = vcmask 1043456   ;;  %s581_s4 = sshll.u32 %s989_s30, 3  ;;  %s592_s5 = sshll.u32 %s874_s16, 7 }
  0x5a   : > { %604 = vmatprep.subr.bf16.mxu1 %v830_v6  ;;  %s200_s25 = scalar_lea.vmem [#allocation7], %s581_s4  ;;  %s1019_s10 = scalar_lea.hbm %s1064_s3, %s592_s5 }
  0x5b   : > { %267 = vmatpush1.bf16.msra.mxu0 %v688_v4  ;;  %v220_v12 = vrot.slane %v211_v10, %v219_v9  ;;  %v216_v14 = vrot.slane %v211_v10, %v215_v11  ;;  %v224_v33 = vrot.slane %v211_v10, %v223_v30  ;;  %s492_s26 = sshll.u32 %s200_s25, 4  ;;  %s479_s11 = scalar_lea.sflag [#allocation4], %s989_s30  ;;  %s1014_s26 = int_to_ptr.vmem [resolvable:$true] %s492_s26 }
  0x5c   : > { %610 = vmatprep.subr.mxu0 %v830_v6  ;;  %s753_s27 = scalar_lea.vmem %s1014_s26, 128  ;;  %s832_s16 = smov [#allocation7]  }
  0x5d   : > { %605 = vmatpush3.bf16.msra.mxu1 %v690_v21  ;;  %p754_p4 = scmp.ne.s32.totalorder %s1014_s26, %s753_s27  ;;  %s757_s28 = sshll.u32 %s832_s16, 4  ;;  %s758_s28 = int_to_ptr.vmem [resolvable:$false] %s757_s28 }
  0x5e   : > { %588 = vmatmul.mubr.msk.bf16.vlgmr.msra.gmra.mrb[0].mxu0 %vm260_vm0, %v202_v5  ;;  %615 = vmatprep.subr.bf16.mxu1 %v830_v6  ;;  %s759_s29 = scalar_lea.vmem %s758_s28, 256  ;;  %p760_p10 = scmp.lt.s32.totalorder %s1014_s26, %s758_s28 }
  0x5f   : > { %612 = vmatprep.mubr.msk.f32.mxu0 %vm831_vm1, %v830_v6  ;;  %p755_p6 = pnand %p754_p4, %p944_p12  ;;  %p761_p13 = scmp.lt.s32.totalorder %s759_s29, %s753_s27 }
  0x60   : > { %607 = vmatmul.mubr.msk.bf16.vlgmr.msra.gmra.mrb[0].mxu1 %vm260_vm0, %v202_v5 }
  0x61   : > { %617 = vmatprep.mubr.msk.bf16.mxu1 %vm831_vm1, %v830_v6  ;;  %p756_p8 = pneg %p755_p6  ;;  %p762_p3 = por %p761_p13, %p760_p10 }
  0x63   : > { %p763_p7 = pnand %p762_p3, %p756_p8 }
 0x131   : > { %v298_v13 = vpop.f32.mrb[0].mxu0 }
 0x132   : > { %v300_v15 = vpop.f32.mrb[1].mxu0  ;;  %v299_v19 = vadd.f32 %v298_v13, %v216_v14 }
 0x133   : > { %v301_v16 = vadd.f32 %v300_v15, %v220_v12  ;;  %v302_v17 = vpop.f32.mrb[2].mxu0  ;;  %v339_v31 = vpop.f32.mrb[0].mxu1 }
 0x134   : > { %v303_v18 = vpop.f32.mrb[3].mxu0  ;;  %v608_v32 = vpop.f32.mrb[1].mxu1  ;;  %v340_v36 = vadd.f32 %v339_v31, %v224_v33 }
 0x135   : > { %611 = vmatpush3.xpose.msra.mxu0 %v301_v16  ;;  %v342_v34 = vpop.f32.mrb[2].mxu1 }
 0x136   : > { %v609_v35 = vpop.f32.mrb[3].mxu1  ;;  %v429_v37 = vpack.c.bf16 %v340_v36, %v340_v36 }
 0x138   : > { %613 = vmatmul.mubr.f32.vlgmr.msra.gmra.mrb[4].mxu0 %v299_v19  ;;  %v435_v38 = vsel %vm433_vm3, %v429_v37, 0 }
 0x139   : > { %616 = vmatpush3.bf16.msra.mxu1 %v435_v38 }
 0x20b   : > { %v411_v22 = vpop.f32.mrb[4].mxu0 }
 0x20c   : > { %v614_v23 = vpop.f32.mrb[5].mxu0  ;;  %v416_v24 = vsel %vm415_vm2, %v411_v22, -inf }
 0x20d   : > { %417 = vmax.xlane.f32.xlu0 %v416_v24 }
 0x29a   : > { %v418_v25 = vpop.xlane.xlu0 %417 }
 0x29b   : > { %v419_v26 = vsub.f32 %v411_v22, %v418_v25 }
 0x29d   : > { %v420_v27 = vmul.f32 1.442695, %v419_v26 }
 0x29f   : > { %691 = vpow2.f32 %v420_v27 }
 0x2a9   : > { %v692_v28 = vpop.eup %691 }
 0x2aa   : > { %v422_v29 = vsel %vm415_vm2, %v692_v28, 0.0 }
 0x2ab   : > { %423 = vadd.xlane.f32.xlu0 %v422_v29 }
 0x338   : > { %v424_v39 = vpop.xlane.xlu0 %423 }
 0x339   : > { %693 = vrcp.f32 %v424_v39 }
 0x343   : > { %v694_v40 = vpop.eup %693 }
 0x344   : > { %v426_v41 = vmul.f32 0.25, %v694_v40 }
 0x346   : > { %v427_v42 = vmul.f32 %v692_v28, %v426_v41 }
 0x348   : > { %v428_v43 = vpack.c.bf16 %v427_v42, %v427_v42 }
 0x34a   : > { %618 = vmatmul.mubr.msk.bf16.vlgmr.msra.gmra.mrb[4].mxu1 %vm415_vm2, %v428_v43 }
 0x41d   : > { %v471_v44 = vpop.f32.mrb[4].mxu1 }
 0x41e   : > { %477 = vst [vmem:[%s200_s25] sm:$0xff] %v471_v44  ;;  %v619_v45 = vpop.f32.mrb[5].mxu1 }
 0x41f   : > { %v474_v46 = vpop.f32.mrb[6].mxu1 }
 0x420   : > { %766 = shalt.err (!%p763_p7)
}
 0x421   : > { %s767_s23 = scalar_lea.hbm %s1019_s10, 128  ;;  %s771_s6 = scalar_lea.hbm %s1064_s3, 256 }
 0x422   : > { %p768_p9 = scmp.ne.s32.totalorder %s1019_s10, %s767_s23  ;;  %p772_p0 = scmp.lt.u32.totalorder %s1019_s10, %s1064_s3 }
 0x423   : > { %p773_p1 = scmp.lt.u32.totalorder %s771_s6, %s767_s23  ;;  %p775_p4 = scmp.lt.u32.totalorder %s767_s23, %s1019_s10 }
 0x424   : > { %p769_p2 = pnand %p768_p9, %p944_p12 }
 0x425   : > { %p774_p11 = por %p773_p1, %p772_p0 }
 0x426   : > { %p770_p5 = pneg %p769_p2 }
 0x427   : > { %p776_p6 = por %p775_p4, %p774_p11 }
 0x429   : > { %p777_p8 = pnand %p776_p6, %p770_p5 }
 0x42b   : > { %780 = shalt.err (!%p777_p8)
}
 0x42c   : > { %627 = dma.vmem_to_hbm [thread:$0]  (%p944_p12), %s1014_s26, 128, %s1019_s10, %s479_s11   ;;  %v620_v47 = vpop.f32.mrb[7].mxu1 }
 0x42d PF: > { %s504_s20 = sand.u32 1, %s811_s12   ;;  %p1079_p10 = scmp.ne.s32.totalorder %s1069_s19, 0 }
 0x42e   : > { %p1080_p13 = scmp.ge.s32.totalorder %s823_s15, 2  ;;  %s505_s4 = scalar_lea.sflag [#allocation4], %s504_s20 }
 0x430   : > { %p638_p3 = pnand %p1080_p13, %p1079_p10 }
 0x432   : > { %806 = dma.done.wait (!%p638_p3), %s505_s4, 128  }
 0x433   : > { %808 = vsyncadd (!%p638_p3), %s505_s4, 4294967168  ;;  %p17_p7 = scmp.ge.s32.totalorder %s909_s24, 4   ;;  %s1081_s12 = smov %s815_s13 }
 0x434   : > { %s1082_s13 = smov %s819_s14  ;;  %s1083_s14 = smov %s940_s17 }
 0x435   : > { %s1084_s15 = smov %s909_s24  ;;  %19 = sbr.rel (!%p17_p7) target bundleno = 6 (0x6), region = 81 }
 0x43c   :  { %510 = vsyncpa [#allocation3], 1 }
 0x43d   :  { %512 = vsyncpa [#allocation3 + $0x1], 1 }
 0x43e   :  { %513 = vsyncpa [#allocation6], 1 }
 0x43f   :  { %514 = vsyncpa [#allocation4], 1 }
 0x440   :  { %516 = vsyncpa [#allocation4 + $0x1], 1 }

</bundles_post_ra>
